<compile_context>
chip_gen: v6e
topology: v6e:2x2x1
jax: 0.10.0
libtpu: 0.0.40
codegen_flags: <defaults>
</compile_context>

<pallas_src>
import functools

import jax
import jax.numpy as jnp
from jax import lax
from jax.experimental import pallas as pl
from jax.experimental.pallas import tpu as pltpu


def ddac_kernel(xpf_ref, w_ref, b_ref, m_ref, out_ref, *, H, W, sub):
    # xpf_ref: (B, 1, Lp)   row-padded flat images, Lp = H*W + 2*W + 2
    # w_ref:   (9, 1, 30, 1) fused conv weights, tap t = dy*3 + dx
    # b_ref:   (1, 30, 1)    fused bias
    # m_ref:   (3, 1, HW)    column-validity masks per dx (dx=1 row is ones)
    # out_ref: (B, 30, HW)   lane-dense output block
    B = out_ref.shape[0]
    HW = H * W

    wv = w_ref[...]        # (9, 1, 30, 1)
    bias = b_ref[...]      # (1, 30, 1)
    mv = m_ref[...]        # (3, 1, HW)

    # Process the batch tile in small sub-batches so the f32 accumulator
    # (sub, 30, HW) stays vreg-resident (no VMEM round-trips per tap).
    for b0 in range(0, B, sub):
        se = min(sub, B - b0)
        xc = xpf_ref[b0:b0 + se]                     # (se, 1, Lp)
        acc = jnp.zeros((se, 30, HW), dtype=jnp.float32)
        for dy in range(3):
            for dx in range(3):
                t = dy * 3 + dx
                s = dy * W + dx                      # static lane offset
                tap = xc[:, :, s:s + HW]             # (se, 1, HW) lane slice
                if dx != 1:                          # fix column wrap-around
                    tap = tap * mv[dx]
                acc = acc + wv[t] * tap              # (1,30,1)*(se,1,HW)
        # Fused bias (added once) + Hardtanh(-10, 10).
        out_ref[b0:b0 + se] = jnp.clip(acc + bias, -10.0, 10.0)


def ddac_forward(x, w1, b1, w2, b2, *, b_tile=None):
    """x: (N, 1, H, W) float32 (NCHW, like the PyTorch module).
    w1: (8, 1, 3, 3), b1: (8,), w2: (30, 8, 1, 1), b2: (30,).
    Returns (N, 30, H, W) float32."""
    N, C, H, W = x.shape
    assert C == 1
    HW = H * W
    Lp = HW + 2 * W + 2          # row-padded flat length
    off0 = W + 1                 # flat position of pixel (0, 0)

    # ---- Fuse conv1 (3x3, 1->8) o conv2 (1x1, 8->30) into one linear map ----
    w1m = w1.reshape(8, 9).T                               # (9, 8), t = ky*3+kx
    w2m = w2.reshape(30, 8).T                              # (8, 30)
    wf = (w1m @ w2m).reshape(9, 1, 30, 1)                  # (9, 1, 30, 1)
    bf = (b1.reshape(1, 8) @ w2m + b2.reshape(1, 30)).reshape(1, 30, 1)

    # ---- Column-validity masks (flat-index column wrap for dx = 0 / 2) ------
    colw = jnp.arange(HW, dtype=jnp.int32) % W
    ml = (colw != 0).astype(jnp.float32)                   # for dx == 0
    mr = (colw != W - 1).astype(jnp.float32)               # for dx == 2
    mask3 = jnp.stack([ml, jnp.ones((HW,), jnp.float32), mr]).reshape(3, 1, HW)

    # ---- Batch tiling: >=2 grid steps (v7x dual TC), cap block for VMEM -----
    if b_tile is None:
        b_tile = min(32, max(1, pl.cdiv(N, 2)))
    nb = pl.cdiv(N, b_tile)
    Np = nb * b_tile

    # Flatten (free reshape of NCHW), row-pad once, pad batch to a tile multiple.
    xpf = jnp.pad(x.reshape(N, 1, HW), ((0, Np - N), (0, 0), (off0, W + 1)))

    out = pl.pallas_call(
        functools.partial(ddac_kernel, H=H, W=W, sub=min(4, b_tile)),
        out_shape=jax.ShapeDtypeStruct((Np, 30, HW), jnp.float32),
        grid=(nb,),
        in_specs=[
            pl.BlockSpec((b_tile, 1, Lp), lambda n: (n, 0, 0)),
            pl.BlockSpec((9, 1, 30, 1), lambda n: (0, 0, 0, 0)),
            pl.BlockSpec((1, 30, 1), lambda n: (0, 0, 0)),
            pl.BlockSpec((3, 1, HW), lambda n: (0, 0, 0)),
        ],
        out_specs=pl.BlockSpec((b_tile, 30, HW), lambda n: (n, 0, 0)),
        compiler_params=pltpu.CompilerParams(dimension_semantics=("parallel",)),
    )(xpf, wf, bf, mask3)

    # (Np, 30, H*W) -> (N, 30, H, W): reshape only, no transpose / extra HBM pass.
    out = out.reshape(Np, 30, H, W)
    return out[:N] if Np != N else out


def ddac_reference(x, w1, b1, w2, b2):
    """Pure-JAX reference matching the PyTorch forward exactly."""
    dn = ("NCHW", "OIHW", "NCHW")
    y = lax.conv_general_dilated(x, w1, (1, 1), ((1, 1), (1, 1)),
                                 dimension_numbers=dn)
    y = y + b1.reshape(1, 8, 1, 1)
    y = lax.conv_general_dilated(y, w2, (1, 1), ((0, 0), (0, 0)),
                                 dimension_numbers=dn)
    y = y + b2.reshape(1, 30, 1, 1)
    return jnp.clip(y, -10.0, 10.0)


if __name__ == "__main__":
    key = jax.random.PRNGKey(0)
    kx, k1, kb1, k2, kb2 = jax.random.split(key, 5)

    # Small shapes consistent with the module: batch=2, C_in=1, spatial=16.
    x = jax.random.normal(kx, (2, 1, 16, 16), dtype=jnp.float32)

    # TODO(synk): the module loads `ddac_npy` from outside as the 3x3 weights;
    # a deterministic random stand-in of the same shape is used here.
    w1 = jax.random.normal(k1, (8, 1, 3, 3), dtype=jnp.float32) * 0.5   # ddac.weight
    b1 = jax.random.normal(kb1, (8,), dtype=jnp.float32) * 0.1          # ddac.bias
    w2 = jax.random.normal(k2, (30, 8, 1, 1), dtype=jnp.float32) * 0.5  # conv.weight
    b2 = jax.random.normal(kb2, (30,), dtype=jnp.float32) * 0.1         # conv.bias

    out = jax.block_until_ready(ddac_forward(x, w1, b1, w2, b2))
    ref = jax.block_until_ready(ddac_reference(x, w1, b1, w2, b2))

    assert out.shape == (2, 30, 16, 16), out.shape
    assert jnp.allclose(out, ref, atol=1e-4, rtol=1e-4), \
        float(jnp.max(jnp.abs(out - ref)))

    print("KERNEL_OK")
</pallas_src>

<mosaic_0001>
module attributes {stable_mosaic.version = 11 : i64} {
  func.func @ddac_kernel(%arg0: i32, %arg1: memref<1x1x290xf32, #tpu.memory_space<vmem>>, %arg2: memref<9x1x30x1xf32, #tpu.memory_space<vmem>>, %arg3: memref<1x30x1xf32, #tpu.memory_space<vmem>>, %arg4: memref<3x1x256xf32, #tpu.memory_space<vmem>>, %arg5: memref<1x30x256xf32, #tpu.memory_space<vmem>>) attributes {dimension_semantics = [#tpu.dimension_semantics<parallel>], iteration_bounds = array<i64: 2>, scalar_prefetch = 0 : i64, scratch_operands = 0 : i64, tpu.core_type = #tpu.core_type<tc>, window_params = [{transform_indices = @transform_0, window_bounds = array<i64: 1, 1, 290>}, {pipeline_mode = #tpu.pipeline_mode<synchronous>, transform_indices = @transform_1, window_bounds = array<i64: 9, 1, 30, 1>}, {pipeline_mode = #tpu.pipeline_mode<synchronous>, transform_indices = @transform_2, window_bounds = array<i64: 1, 30, 1>}, {pipeline_mode = #tpu.pipeline_mode<synchronous>, transform_indices = @transform_3, window_bounds = array<i64: 3, 1, 256>}, {transform_indices = @transform_4, window_bounds = array<i64: 1, 30, 256>}]} {
    %c0 = arith.constant 0 : index
    %c0_0 = arith.constant 0 : index
    %c0_1 = arith.constant 0 : index
    %c0_2 = arith.constant 0 : index
    %0 = vector.load %arg2[%c0, %c0_0, %c0_1, %c0_2] : memref<9x1x30x1xf32, #tpu.memory_space<vmem>>, vector<9x1x30x1xf32>
    %c0_3 = arith.constant 0 : index
    %c0_4 = arith.constant 0 : index
    %c0_5 = arith.constant 0 : index
    %1 = vector.load %arg3[%c0_3, %c0_4, %c0_5] : memref<1x30x1xf32, #tpu.memory_space<vmem>>, vector<1x30x1xf32>
    %c0_6 = arith.constant 0 : index
    %c0_7 = arith.constant 0 : index
    %c0_8 = arith.constant 0 : index
    %2 = vector.load %arg4[%c0_6, %c0_7, %c0_8] : memref<3x1x256xf32, #tpu.memory_space<vmem>>, vector<3x1x256xf32>
    %c0_9 = arith.constant 0 : index
    %c0_10 = arith.constant 0 : index
    %c0_11 = arith.constant 0 : index
    %3 = vector.load %arg1[%c0_9, %c0_10, %c0_11] : memref<1x1x290xf32, #tpu.memory_space<vmem>>, vector<1x1x290xf32>
    %cst = arith.constant 0.000000e+00 : f32
    %4 = vector.broadcast %cst : f32 to vector<1x30x256xf32>
    %5 = vector.extract_strided_slice %3 {offsets = [0, 0, 0], sizes = [1, 1, 256], strides = [1, 1, 1]} : vector<1x1x290xf32> to vector<1x1x256xf32>
    %6 = vector.extract_strided_slice %2 {offsets = [0, 0, 0], sizes = [1, 1, 256], strides = [1, 1, 1]} : vector<3x1x256xf32> to vector<1x1x256xf32>
    %7 = vector.shape_cast %6 : vector<1x1x256xf32> to vector<1x256xf32>
    %8 = vector.shape_cast %7 : vector<1x256xf32> to vector<1x1x256xf32>
    %9 = arith.mulf %5, %8 : vector<1x1x256xf32>
    %10 = vector.extract_strided_slice %0 {offsets = [0, 0, 0, 0], sizes = [1, 1, 30, 1], strides = [1, 1, 1, 1]} : vector<9x1x30x1xf32> to vector<1x1x30x1xf32>
    %11 = vector.shape_cast %10 : vector<1x1x30x1xf32> to vector<1x30x1xf32>
    %12 = vector.broadcast %11 : vector<1x30x1xf32> to vector<1x30x256xf32>
    %13 = vector.broadcast %9 : vector<1x1x256xf32> to vector<1x30x256xf32>
    %14 = arith.mulf %12, %13 : vector<1x30x256xf32>
    %15 = arith.addf %4, %14 : vector<1x30x256xf32>
    %16 = vector.extract_strided_slice %3 {offsets = [0, 0, 1], sizes = [1, 1, 256], strides = [1, 1, 1]} : vector<1x1x290xf32> to vector<1x1x256xf32>
    %17 = vector.extract_strided_slice %0 {offsets = [1, 0, 0, 0], sizes = [1, 1, 30, 1], strides = [1, 1, 1, 1]} : vector<9x1x30x1xf32> to vector<1x1x30x1xf32>
    %18 = vector.shape_cast %17 : vector<1x1x30x1xf32> to vector<1x30x1xf32>
    %19 = vector.broadcast %18 : vector<1x30x1xf32> to vector<1x30x256xf32>
    %20 = vector.broadcast %16 : vector<1x1x256xf32> to vector<1x30x256xf32>
    %21 = arith.mulf %19, %20 : vector<1x30x256xf32>
    %22 = arith.addf %15, %21 : vector<1x30x256xf32>
    %23 = vector.extract_strided_slice %3 {offsets = [0, 0, 2], sizes = [1, 1, 256], strides = [1, 1, 1]} : vector<1x1x290xf32> to vector<1x1x256xf32>
    %24 = vector.extract_strided_slice %2 {offsets = [2, 0, 0], sizes = [1, 1, 256], strides = [1, 1, 1]} : vector<3x1x256xf32> to vector<1x1x256xf32>
    %25 = vector.shape_cast %24 : vector<1x1x256xf32> to vector<1x256xf32>
    %26 = vector.shape_cast %25 : vector<1x256xf32> to vector<1x1x256xf32>
    %27 = arith.mulf %23, %26 : vector<1x1x256xf32>
    %28 = vector.extract_strided_slice %0 {offsets = [2, 0, 0, 0], sizes = [1, 1, 30, 1], strides = [1, 1, 1, 1]} : vector<9x1x30x1xf32> to vector<1x1x30x1xf32>
    %29 = vector.shape_cast %28 : vector<1x1x30x1xf32> to vector<1x30x1xf32>
    %30 = vector.broadcast %29 : vector<1x30x1xf32> to vector<1x30x256xf32>
    %31 = vector.broadcast %27 : vector<1x1x256xf32> to vector<1x30x256xf32>
    %32 = arith.mulf %30, %31 : vector<1x30x256xf32>
    %33 = arith.addf %22, %32 : vector<1x30x256xf32>
    %34 = vector.extract_strided_slice %3 {offsets = [0, 0, 16], sizes = [1, 1, 256], strides = [1, 1, 1]} : vector<1x1x290xf32> to vector<1x1x256xf32>
    %35 = vector.extract_strided_slice %2 {offsets = [0, 0, 0], sizes = [1, 1, 256], strides = [1, 1, 1]} : vector<3x1x256xf32> to vector<1x1x256xf32>
    %36 = vector.shape_cast %35 : vector<1x1x256xf32> to vector<1x256xf32>
    %37 = vector.shape_cast %36 : vector<1x256xf32> to vector<1x1x256xf32>
    %38 = arith.mulf %34, %37 : vector<1x1x256xf32>
    %39 = vector.extract_strided_slice %0 {offsets = [3, 0, 0, 0], sizes = [1, 1, 30, 1], strides = [1, 1, 1, 1]} : vector<9x1x30x1xf32> to vector<1x1x30x1xf32>
    %40 = vector.shape_cast %39 : vector<1x1x30x1xf32> to vector<1x30x1xf32>
    %41 = vector.broadcast %40 : vector<1x30x1xf32> to vector<1x30x256xf32>
    %42 = vector.broadcast %38 : vector<1x1x256xf32> to vector<1x30x256xf32>
    %43 = arith.mulf %41, %42 : vector<1x30x256xf32>
    %44 = arith.addf %33, %43 : vector<1x30x256xf32>
    %45 = vector.extract_strided_slice %3 {offsets = [0, 0, 17], sizes = [1, 1, 256], strides = [1, 1, 1]} : vector<1x1x290xf32> to vector<1x1x256xf32>
    %46 = vector.extract_strided_slice %0 {offsets = [4, 0, 0, 0], sizes = [1, 1, 30, 1], strides = [1, 1, 1, 1]} : vector<9x1x30x1xf32> to vector<1x1x30x1xf32>
    %47 = vector.shape_cast %46 : vector<1x1x30x1xf32> to vector<1x30x1xf32>
    %48 = vector.broadcast %47 : vector<1x30x1xf32> to vector<1x30x256xf32>
    %49 = vector.broadcast %45 : vector<1x1x256xf32> to vector<1x30x256xf32>
    %50 = arith.mulf %48, %49 : vector<1x30x256xf32>
    %51 = arith.addf %44, %50 : vector<1x30x256xf32>
    %52 = vector.extract_strided_slice %3 {offsets = [0, 0, 18], sizes = [1, 1, 256], strides = [1, 1, 1]} : vector<1x1x290xf32> to vector<1x1x256xf32>
    %53 = vector.extract_strided_slice %2 {offsets = [2, 0, 0], sizes = [1, 1, 256], strides = [1, 1, 1]} : vector<3x1x256xf32> to vector<1x1x256xf32>
    %54 = vector.shape_cast %53 : vector<1x1x256xf32> to vector<1x256xf32>
    %55 = vector.shape_cast %54 : vector<1x256xf32> to vector<1x1x256xf32>
    %56 = arith.mulf %52, %55 : vector<1x1x256xf32>
    %57 = vector.extract_strided_slice %0 {offsets = [5, 0, 0, 0], sizes = [1, 1, 30, 1], strides = [1, 1, 1, 1]} : vector<9x1x30x1xf32> to vector<1x1x30x1xf32>
    %58 = vector.shape_cast %57 : vector<1x1x30x1xf32> to vector<1x30x1xf32>
    %59 = vector.broadcast %58 : vector<1x30x1xf32> to vector<1x30x256xf32>
    %60 = vector.broadcast %56 : vector<1x1x256xf32> to vector<1x30x256xf32>
    %61 = arith.mulf %59, %60 : vector<1x30x256xf32>
    %62 = arith.addf %51, %61 : vector<1x30x256xf32>
    %63 = vector.extract_strided_slice %3 {offsets = [0, 0, 32], sizes = [1, 1, 256], strides = [1, 1, 1]} : vector<1x1x290xf32> to vector<1x1x256xf32>
    %64 = vector.extract_strided_slice %2 {offsets = [0, 0, 0], sizes = [1, 1, 256], strides = [1, 1, 1]} : vector<3x1x256xf32> to vector<1x1x256xf32>
    %65 = vector.shape_cast %64 : vector<1x1x256xf32> to vector<1x256xf32>
    %66 = vector.shape_cast %65 : vector<1x256xf32> to vector<1x1x256xf32>
    %67 = arith.mulf %63, %66 : vector<1x1x256xf32>
    %68 = vector.extract_strided_slice %0 {offsets = [6, 0, 0, 0], sizes = [1, 1, 30, 1], strides = [1, 1, 1, 1]} : vector<9x1x30x1xf32> to vector<1x1x30x1xf32>
    %69 = vector.shape_cast %68 : vector<1x1x30x1xf32> to vector<1x30x1xf32>
    %70 = vector.broadcast %69 : vector<1x30x1xf32> to vector<1x30x256xf32>
    %71 = vector.broadcast %67 : vector<1x1x256xf32> to vector<1x30x256xf32>
    %72 = arith.mulf %70, %71 : vector<1x30x256xf32>
    %73 = arith.addf %62, %72 : vector<1x30x256xf32>
    %74 = vector.extract_strided_slice %3 {offsets = [0, 0, 33], sizes = [1, 1, 256], strides = [1, 1, 1]} : vector<1x1x290xf32> to vector<1x1x256xf32>
    %75 = vector.extract_strided_slice %0 {offsets = [7, 0, 0, 0], sizes = [1, 1, 30, 1], strides = [1, 1, 1, 1]} : vector<9x1x30x1xf32> to vector<1x1x30x1xf32>
    %76 = vector.shape_cast %75 : vector<1x1x30x1xf32> to vector<1x30x1xf32>
    %77 = vector.broadcast %76 : vector<1x30x1xf32> to vector<1x30x256xf32>
    %78 = vector.broadcast %74 : vector<1x1x256xf32> to vector<1x30x256xf32>
    %79 = arith.mulf %77, %78 : vector<1x30x256xf32>
    %80 = arith.addf %73, %79 : vector<1x30x256xf32>
    %81 = vector.extract_strided_slice %3 {offsets = [0, 0, 34], sizes = [1, 1, 256], strides = [1, 1, 1]} : vector<1x1x290xf32> to vector<1x1x256xf32>
    %82 = vector.extract_strided_slice %2 {offsets = [2, 0, 0], sizes = [1, 1, 256], strides = [1, 1, 1]} : vector<3x1x256xf32> to vector<1x1x256xf32>
    %83 = vector.shape_cast %82 : vector<1x1x256xf32> to vector<1x256xf32>
    %84 = vector.shape_cast %83 : vector<1x256xf32> to vector<1x1x256xf32>
    %85 = arith.mulf %81, %84 : vector<1x1x256xf32>
    %86 = vector.extract_strided_slice %0 {offsets = [8, 0, 0, 0], sizes = [1, 1, 30, 1], strides = [1, 1, 1, 1]} : vector<9x1x30x1xf32> to vector<1x1x30x1xf32>
    %87 = vector.shape_cast %86 : vector<1x1x30x1xf32> to vector<1x30x1xf32>
    %88 = vector.broadcast %87 : vector<1x30x1xf32> to vector<1x30x256xf32>
    %89 = vector.broadcast %85 : vector<1x1x256xf32> to vector<1x30x256xf32>
    %90 = arith.mulf %88, %89 : vector<1x30x256xf32>
    %91 = arith.addf %80, %90 : vector<1x30x256xf32>
    %92 = vector.broadcast %1 : vector<1x30x1xf32> to vector<1x30x256xf32>
    %93 = arith.addf %91, %92 : vector<1x30x256xf32>
    %cst_12 = arith.constant -1.000000e+01 : f32
    %cst_13 = arith.constant 1.000000e+01 : f32
    %94 = vector.broadcast %cst_12 : f32 to vector<1x30x256xf32>
    %95 = arith.maximumf %94, %93 : vector<1x30x256xf32>
    %96 = vector.broadcast %cst_13 : f32 to vector<1x30x256xf32>
    %97 = arith.minimumf %96, %95 : vector<1x30x256xf32>
    %c0_14 = arith.constant 0 : index
    %c0_15 = arith.constant 0 : index
    %c0_16 = arith.constant 0 : index
    %98 = vector.load %arg5[%c0_14, %c0_15, %c0_16] : memref<1x30x256xf32, #tpu.memory_space<vmem>>, vector<1x30x256xf32>
    tpu.vector_store %arg5[%c0_14, %c0_15, %c0_16], %97 {strides = array<i32>} : memref<1x30x256xf32, #tpu.memory_space<vmem>>, vector<1x30x256xf32>,
    return
  }
  func.func @transform_0(%arg0: i32) -> (i32, i32, i32) {
    %c0_i32 = arith.constant 0 : i32
    %c0_i32_0 = arith.constant 0 : i32
    %c0_i32_1 = arith.constant 0 : i32
    return %arg0, %c0_i32, %c0_i32_0 : i32, i32, i32
  }
  func.func @transform_1(%arg0: i32) -> (i32, i32, i32, i32) {
    %c0_i32 = arith.constant 0 : i32
    %c0_i32_0 = arith.constant 0 : i32
    %c0_i32_1 = arith.constant 0 : i32
    %c0_i32_2 = arith.constant 0 : i32
    %c0_i32_3 = arith.constant 0 : i32
    return %c0_i32, %c0_i32_0, %c0_i32_1, %c0_i32_2 : i32, i32, i32, i32
  }
  func.func @transform_2(%arg0: i32) -> (i32, i32, i32) {
    %c0_i32 = arith.constant 0 : i32
    %c0_i32_0 = arith.constant 0 : i32
    %c0_i32_1 = arith.constant 0 : i32
    %c0_i32_2 = arith.constant 0 : i32
    return %c0_i32, %c0_i32_0, %c0_i32_1 : i32, i32, i32
  }
  func.func @transform_3(%arg0: i32) -> (i32, i32, i32) {
    %c0_i32 = arith.constant 0 : i32
    %c0_i32_0 = arith.constant 0 : i32
    %c0_i32_1 = arith.constant 0 : i32
    %c0_i32_2 = arith.constant 0 : i32
    return %c0_i32, %c0_i32_0, %c0_i32_1 : i32, i32, i32
  }
  func.func @transform_4(%arg0: i32) -> (i32, i32, i32) {
    %c0_i32 = arith.constant 0 : i32
    %c0_i32_0 = arith.constant 0 : i32
    %c0_i32_1 = arith.constant 0 : i32
    return %arg0, %c0_i32, %c0_i32_0 : i32, i32, i32
  }
}

</mosaic_0001>

<bundles_post_ra>
// kernel: tpu_custom_call.1
= control target key start
LH: loop header
LB: loop body
LE: loop exit
PB: predicated region body
PF: predicated region fallthrough
CT: control target
= control target key end

     0   :  { %s1360_s15 = smov 0   ;;  %s1854_s0 = inlined_call_operand.vmem [shape: f32[2,1,290], index: 0, kind: input, shape index: {}]   ;;  %s1855_s1 = inlined_call_operand.vmem [shape: f32[9,1,30,1], index: 1, kind: input, shape index: {}]   ;;  %s1856_s2 = inlined_call_operand.vmem [shape: f32[1,30,1], index: 2, kind: input, shape index: {}]   ;;  %s1857_s3 = inlined_call_operand.vmem [shape: f32[3,1,256], index: 3, kind: input, shape index: {}]   ;;  %s1858_s4 = inlined_call_operand.vmem [shape: f32[2,30,256], index: 4, kind: output, shape index: {}]  }
   0x1 LB: > { %s1270_s16 = sadd.s32 4294967295, %s1319_s15   ;;  %p1274_p0 = scmp.ge.s32.totalorder %s1319_s15, 1  ;;  %s1319_s15 = sphi %s1360_s15, %s14_s15  }
   0x2   : > { %p161_p1 = scmp.lt.s32.totalorder %s1319_s15, 3 }
   0x4   : > { %p162_p2 = pnand %p1274_p0, %p161_p1 }
   0x5   : > { %s1322_s11 = smov (!%p162_p2), 2   ;;  %s1323_s22 = smov (!%p162_p2), 16  }
   0x6   : > { %165 = sbr.rel (%p162_p2) target bundleno = 727 (0x2d7), region = 36  ;;  %p186_p3 = scmp.lt.s32.totalorder (!%p162_p2), %s1270_s16, 1 }
   0x7   : > { %s1324_s19 = smov (!%p162_p2), 127   ;;  %s1325_s20 = smov (!%p162_p2), 126  }
   0x8   : > { %s1326_s21 = smov (!%p162_p2), 112   ;;  %s1328_s25 = smov (!%p162_p2), 18  }
   0x9   : > { %s1329_s6 = smov (!%p162_p2), 110   ;;  %s1330_s9 = smov (!%p162_p2), 32  }
   0xa   : > { %s1331_s26 = smov (!%p162_p2), 34   ;;  %s1333_s10 = smov (!%p162_p2), 95  }
   0xb   : > { %v197_v0 = vld [vmem:[%s1855_s1 + $0x10] sm:$0xff]  ;;  %v195_v1 = vld [vmem:[%s1855_s1] sm:$0xff]  ;;  %v1321_v2 = vmov 0   ;;  %v198_v3 = vld [vmem:[%s1855_s1 + $0x18] sm:$0x3f]  ;;  %s1860_s16 = smov (!%p186_p3, %s1270_s16), 1  ;;  %v260_v23 = vlaneseq }
   0xc   : > { %1312 = vset.pattern.permute.xlu1 %v1321_v2  ;;  %1311 = vset.pattern.permute.xlu0 %v1321_v2  ;;  %v196_v4 = vld [vmem:[%s1855_s1 + $0x8] sm:$0xff]  ;;  %v199_v6 = vld [vmem:[%s1855_s1 + $0x20] sm:$0xff]  ;;  %v202_v7 = vld [vmem:[%s1855_s1 + $0x38] sm:$0x3f]  ;;  %s1288_s13 = smul.u32 3, %s1860_s16  ;;  %vm399_vm0 = vcmask 15360  }
   0xd   : > { %251 = vperm.xlu1 %1312, %v197_v0   ;;  %241 = vperm.xlu0 %1311, %v195_v1   ;;  %v200_v5 = vld [vmem:[%s1855_s1 + $0x28] sm:$0xff]  ;;  %v201_v8 = vld [vmem:[%s1855_s1 + $0x30] sm:$0xff]  ;;  %v203_v9 = vld [vmem:[%s1855_s1 + $0x40] sm:$0xff]  ;;  %v261_v24 = vshrl.u32 %v260_v23, 7  ;;  %vm516_vm1 = vcmask 130048   ;;  %vm487_vm2 = vcmask 1031168  }
   0xe   : > { %v1398_v10 = vld [vmem:[%s1857_s3 + $0x4] sm:$0x3]  ;;  %v205_v11 = vld [vmem:[%s1855_s1 + $0x50] sm:$0xff]  ;;  %v204_v12 = vld [vmem:[%s1855_s1 + $0x48] sm:$0xff]  ;;  %s189_s18 = scalar_lea.vmem %s1854_s0, %s1288_s13  ;;  %vm604_vm3 = vcmask 916480   ;;  %vm370_vm4 = vcmask 1039360  }
   0xf   : > { %v1410_v13 = vld [vmem:[%s1857_s3] sm:$0x3]  ;;  %v206_v14 = vld [vmem:[%s1855_s1 + $0x58] sm:$0x3f]  ;;  %v208_v15 = vld [vmem:[%s1855_s1 + $0x68] sm:$0xff]  ;;  %v1454_v27 = vsub.s32 0, %v261_v24 }
  0x10   : > { %v207_v16 = vld [vmem:[%s1855_s1 + $0x60] sm:$0xff]  ;;  %v210_v17 = vld [vmem:[%s1855_s1 + $0x78] sm:$0x3f]  ;;  %v209_v18 = vld [vmem:[%s1855_s1 + $0x70] sm:$0xff]  ;;  %v1456_v28 = vsub.s32 1, %v261_v24  ;;  %v1472_v34 = vsub.s32 2, %v261_v24 }
  0x11   : > { %256 = vperm.xlu1 %1312, %v198_v3   ;;  %246 = vperm.xlu0 %1311, %v196_v4   ;;  %v212_v19 = vld [vmem:[%s1855_s1 + $0x88] sm:$0xff]  ;;  %v211_v20 = vld [vmem:[%s1855_s1 + $0x80] sm:$0xff]  ;;  %v214_v21 = vld [vmem:[%s1855_s1 + $0x98] sm:$0x3f]  ;;  %vm697_vm5 = vcmask 908288   ;;  %vm725_vm6 = vcmask 146432  }
  0x12   : > { %v213_v22 = vld [vmem:[%s1855_s1 + $0x90] sm:$0xff]  ;;  %v1458_v29 = vld [vmem:[%s189_s18] sm:$0x7]  ;;  %vm813_vm7 = vcmask 900096   ;;  %vm841_vm8 = vcmask 261120   ;;  %vm1050_vm9 = vcmask 277504  }
  0x13   : > { %v1466_v32 = vrot.slane %v1458_v29, %v1456_v28  ;;  %v1470_v33 = vrot.slane %v1458_v29, %v1454_v27  ;;  %v1478_v38 = vrot.slane %v1458_v29, %v1472_v34  ;;  %vm929_vm10 = vcmask 785408  }
  0x14   : > { %vm1022_vm11 = vcmask 777216   ;;  %vm1138_vm12 = vcmask 769024  }
  0x15   : > { %293 = vperm.xlu1 %1312, %v200_v5   ;;  %288 = vperm.xlu0 %1311, %v199_v6  }
  0x19   : > { %303 = vperm.xlu1 %1312, %v202_v7   ;;  %298 = vperm.xlu0 %1311, %v201_v8  }
  0x1d   : > { %405 = vperm.xlu1 %1312, %v203_v9   ;;  %396 = vrot.lane.b32.xlu0 %v1398_v10, %s1322_s11 }
  0x21   : > { %415 = vperm.xlu1 %1312, %v205_v11   ;;  %410 = vperm.xlu0 %1311, %v204_v12  }
  0x25   : > { %513 = vrot.lane.b32.xlu1 %v1410_v13, %s1323_s22  ;;  %420 = vperm.xlu0 %1311, %v206_v14   ;;  %s1327_s22 = smov 111  }
  0x29   : > { %527 = vperm.xlu1 %1312, %v208_v15   ;;  %522 = vperm.xlu0 %1311, %v207_v16  }
  0x2d   : > { %537 = vperm.xlu1 %1312, %v210_v17   ;;  %532 = vperm.xlu0 %1311, %v209_v18  }
  0x31   : > { %636 = vperm.xlu1 %1312, %v212_v19   ;;  %631 = vperm.xlu0 %1311, %v211_v20  }
  0x35   : > { %646 = vperm.xlu1 %1312, %v214_v21   ;;  %641 = vperm.xlu0 %1311, %v213_v22  }
  0x88   : > { %v1447_v25 = vpop.permute.xlu1 %251  ;;  %v1449_v26 = vpop.permute.xlu0 %241 }
  0x8c   : > { %v1460_v30 = vpop.permute.xlu1 %256  ;;  %v1462_v31 = vpop.permute.xlu0 %246 }
  0x90   : > { %v289_v35 = vpop.permute.xlu0 %288  ;;  %v294_v39 = vpop.permute.xlu1 %293 }
  0x91   : > { %v323_v36 = vmul.f32 %v1466_v32, %v289_v35  ;;  %v322_v37 = vmul.f32 %v1470_v33, %v289_v35  ;;  %v325_v41 = vmul.f32 %v1470_v33, %v294_v39  ;;  %v324_v42 = vmul.f32 %v1478_v38, %v289_v35 }
  0x92   : > { %v327_v44 = vmul.f32 %v1478_v38, %v294_v39  ;;  %v326_v45 = vmul.f32 %v1466_v32, %v294_v39 }
  0x93   : > { %348 = vrot.lane.b32.xlu1 %v323_v36, %s1324_s19  ;;  %346 = vrot.lane.b32.xlu0 %v322_v37, %s1324_s19 }
  0x94   : > { %v299_v40 = vpop.permute.xlu0 %298  ;;  %v304_v47 = vpop.permute.xlu1 %303 }
  0x95   : > { %v329_v48 = vmul.f32 %v1466_v32, %v299_v40  ;;  %v328_v49 = vmul.f32 %v1470_v33, %v299_v40  ;;  %v331_v52 = vmul.f32 %v1470_v33, %v304_v47  ;;  %v330_v53 = vmul.f32 %v1478_v38, %v299_v40 }
  0x96   : > { %v333_v57 = vmul.f32 %v1478_v38, %v304_v47  ;;  %v332_v58 = vmul.f32 %v1466_v32, %v304_v47 }
  0x97   : > { %352 = vrot.lane.b32.xlu1 %v325_v41, %s1324_s19  ;;  %350 = vrot.lane.b32.xlu0 %v324_v42, %s1324_s19 }
  0x98   : > { %v397_v43 = vpop.permute.xlu0 %396  ;;  %v406_v54 = vpop.permute.xlu1 %405 }
  0x99   : > { %v398_v46 = vrot.slane %v397_v43, 7 }
  0x9b   : > { %356 = vrot.lane.b32.xlu1 %v327_v44, %s1324_s19  ;;  %354 = vrot.lane.b32.xlu0 %v326_v45, %s1324_s19  ;;  %v400_v50 = vsel %vm399_vm0, %v398_v46, %v397_v43 }
  0x9c   : > { %v402_v51 = vmul.f32 %v400_v50, %v1458_v29  ;;  %v416_v60 = vpop.permute.xlu1 %415  ;;  %v411_v63 = vpop.permute.xlu0 %410 }
  0x9e   : > { %v427_v55 = vrot.slane %v402_v51, %v1454_v27  ;;  %v431_v56 = vrot.slane %v402_v51, %v1456_v28  ;;  %v435_v59 = vrot.slane %v402_v51, %v1472_v34 }
  0x9f   : > { %360 = vrot.lane.b32.xlu1 %v329_v48, %s1324_s19  ;;  %358 = vrot.lane.b32.xlu0 %v328_v49, %s1324_s19 }
  0xa0   : > { %v439_v61 = vmul.f32 %v427_v55, %v406_v54  ;;  %v440_v62 = vmul.f32 %v431_v56, %v406_v54  ;;  %v441_v0 = vmul.f32 %v435_v59, %v406_v54  ;;  %v442_v1 = vmul.f32 %v427_v55, %v411_v63  ;;  %v514_v2 = vpop.permute.xlu1 %513  ;;  %v421_v9 = vpop.permute.xlu0 %420 }
  0xa1   : > { %v443_v3 = vmul.f32 %v431_v56, %v411_v63  ;;  %v444_v4 = vmul.f32 %v435_v59, %v411_v63  ;;  %v515_v5 = vrot.slane %v514_v2, 7  ;;  %v445_v6 = vmul.f32 %v427_v55, %v416_v60  ;;  %v215_v63 = vld [vmem:[%s1855_s1 + $0xa0] sm:$0xff] }
  0xa2   : > { %v446_v7 = vmul.f32 %v431_v56, %v416_v60  ;;  %v447_v12 = vmul.f32 %v435_v59, %v416_v60  ;;  %v448_v14 = vmul.f32 %v427_v55, %v421_v9  ;;  %v449_v17 = vmul.f32 %v431_v56, %v421_v9 }
  0xa3   : > { %364 = vrot.lane.b32.xlu1 %v331_v52, %s1324_s19  ;;  %362 = vrot.lane.b32.xlu0 %v330_v53, %s1324_s19  ;;  %v517_v8 = vsel %vm516_vm1, %v515_v5, %v514_v2  ;;  %v450_v18 = vmul.f32 %v435_v59, %v421_v9  ;;  %v218_v2 = vld [vmem:[%s1855_s1 + $0xb8] sm:$0x3f] }
  0xa4   : > { %v519_v11 = vmul.f32 %v517_v8, %v1458_v29  ;;  %v523_v19 = vpop.permute.xlu0 %522  ;;  %v528_v23 = vpop.permute.xlu1 %527 }
  0xa6   : > { %v544_v15 = vrot.slane %v519_v11, %v1454_v27  ;;  %v548_v16 = vrot.slane %v519_v11, %v1456_v28  ;;  %v552_v20 = vrot.slane %v519_v11, %v1472_v34 }
  0xa7   : > { %368 = vrot.lane.b32.xlu1 %v333_v57, %s1324_s19  ;;  %366 = vrot.lane.b32.xlu0 %v332_v58, %s1324_s19 }
  0xa8   : > { %v557_v21 = vmul.f32 %v548_v16, %v523_v19  ;;  %v556_v22 = vmul.f32 %v544_v15, %v523_v19  ;;  %v559_v24 = vmul.f32 %v544_v15, %v528_v23  ;;  %v558_v35 = vmul.f32 %v552_v20, %v523_v19  ;;  %v533_v39 = vpop.permute.xlu0 %532  ;;  %v538_v42 = vpop.permute.xlu1 %537 }
  0xa9   : > { %v561_v36 = vmul.f32 %v552_v20, %v528_v23  ;;  %v560_v37 = vmul.f32 %v548_v16, %v528_v23  ;;  %v563_v40 = vmul.f32 %v548_v16, %v533_v39  ;;  %v562_v41 = vmul.f32 %v544_v15, %v533_v39 }
  0xaa   : > { %v565_v43 = vmul.f32 %v544_v15, %v538_v42  ;;  %v564_v44 = vmul.f32 %v552_v20, %v533_v39  ;;  %v567_v45 = vmul.f32 %v552_v20, %v538_v42  ;;  %v566_v46 = vmul.f32 %v548_v16, %v538_v42 }
  0xab   : > { %463 = vrot.lane.b32.xlu1 %v439_v61, %s1325_s20  ;;  %465 = vrot.lane.b32.xlu0 %v440_v62, %s1325_s20 }
  0xac   : > { %v632_v47 = vpop.permute.xlu0 %631  ;;  %v637_v50 = vpop.permute.xlu1 %636 }
  0xad   : > { %v650_v48 = vmul.f32 %v632_v47, %v1466_v32  ;;  %v649_v49 = vmul.f32 %v632_v47, %v1470_v33  ;;  %v652_v51 = vmul.f32 %v637_v50, %v1470_v33  ;;  %v651_v52 = vmul.f32 %v632_v47, %v1478_v38 }
  0xae   : > { %v654_v53 = vmul.f32 %v637_v50, %v1478_v38  ;;  %v653_v54 = vmul.f32 %v637_v50, %v1466_v32  ;;  %v238_v47 = vmul.f32 %v1458_v29, %v1410_v13 }
  0xaf   : > { %467 = vrot.lane.b32.xlu1 %v441_v0, %s1325_s20  ;;  %469 = vrot.lane.b32.xlu0 %v442_v1, %s1325_s20  ;;  %v217_v0 = vld [vmem:[%s1855_s1 + $0xb0] sm:$0xff]  ;;  %v216_v1 = vld [vmem:[%s1855_s1 + $0xa8] sm:$0xff] }
  0xb0   : > { %v642_v55 = vpop.permute.xlu0 %641  ;;  %v647_v58 = vpop.permute.xlu1 %646 }
  0xb1   : > { %v656_v56 = vmul.f32 %v642_v55, %v1466_v32  ;;  %v655_v57 = vmul.f32 %v642_v55, %v1470_v33  ;;  %v658_v59 = vmul.f32 %v647_v58, %v1470_v33  ;;  %v657_v60 = vmul.f32 %v642_v55, %v1478_v38 }
  0xb2   : > { %v660_v61 = vmul.f32 %v647_v58, %v1478_v38  ;;  %v659_v62 = vmul.f32 %v647_v58, %v1466_v32 }
  0xb3   : > { %471 = vrot.lane.b32.xlu1 %v443_v3, %s1325_s20  ;;  %473 = vrot.lane.b32.xlu0 %v444_v4, %s1325_s20 }
  0xb7   : > { %475 = vrot.lane.b32.xlu1 %v445_v6, %s1325_s20  ;;  %477 = vrot.lane.b32.xlu0 %v446_v7, %s1325_s20 }
  0xbb   : > { %479 = vrot.lane.b32.xlu1 %v447_v12, %s1325_s20  ;;  %481 = vrot.lane.b32.xlu0 %v448_v14, %s1325_s20 }
  0xbf   : > { %483 = vrot.lane.b32.xlu1 %v449_v17, %s1325_s20  ;;  %485 = vrot.lane.b32.xlu0 %v450_v18, %s1325_s20 }
  0xc3   : > { %582 = vrot.lane.b32.xlu1 %v557_v21, %s1326_s21  ;;  %580 = vrot.lane.b32.xlu0 %v556_v22, %s1326_s21 }
  0xc7   : > { %586 = vrot.lane.b32.xlu1 %v559_v24, %s1326_s21  ;;  %584 = vrot.lane.b32.xlu0 %v558_v35, %s1326_s21 }
  0xcb   : > { %590 = vrot.lane.b32.xlu1 %v561_v36, %s1326_s21  ;;  %588 = vrot.lane.b32.xlu0 %v560_v37, %s1326_s21 }
  0xcf   : > { %594 = vrot.lane.b32.xlu1 %v563_v40, %s1326_s21  ;;  %592 = vrot.lane.b32.xlu0 %v562_v41, %s1326_s21 }
  0xd3   : > { %598 = vrot.lane.b32.xlu1 %v565_v43, %s1326_s21  ;;  %596 = vrot.lane.b32.xlu0 %v564_v44, %s1326_s21 }
  0xd7   : > { %602 = vrot.lane.b32.xlu1 %v567_v45, %s1326_s21  ;;  %600 = vrot.lane.b32.xlu0 %v566_v46, %s1326_s21  ;;  %s1334_s21 = smov 94  }
  0xdb   : > { %675 = vrot.lane.b32.xlu1 %v650_v48, %s1327_s22  ;;  %673 = vrot.lane.b32.xlu0 %v649_v49, %s1327_s22 }
  0xdf   : > { %679 = vrot.lane.b32.xlu1 %v652_v51, %s1327_s22  ;;  %677 = vrot.lane.b32.xlu0 %v651_v52, %s1327_s22  ;;  %v267_v52 = vrot.slane %v238_v47, %v1456_v28 }
  0xe3   : > { %683 = vrot.lane.b32.xlu1 %v654_v53, %s1327_s22  ;;  %681 = vrot.lane.b32.xlu0 %v653_v54, %s1327_s22  ;;  %v275_v54 = vmul.f32 %v267_v52, %v1447_v25 }
  0xe7   : > { %687 = vrot.lane.b32.xlu1 %v656_v56, %s1327_s22  ;;  %685 = vrot.lane.b32.xlu0 %v655_v57, %s1327_s22 }
  0xeb   : > { %691 = vrot.lane.b32.xlu1 %v658_v59, %s1327_s22  ;;  %689 = vrot.lane.b32.xlu0 %v657_v60, %s1327_s22  ;;  %v263_v59 = vrot.slane %v238_v47, %v1454_v27 }
  0xef   : > { %695 = vrot.lane.b32.xlu1 %v660_v61, %s1327_s22  ;;  %693 = vrot.lane.b32.xlu0 %v659_v62, %s1327_s22  ;;  %s1287_s22 = sshll.u32 %s1860_s16, 6 }
  0xf3   : > { %731 = vperm.xlu1 %1312, %v215_v63   ;;  %722 = vrot.lane.b32.xlu0 %v1398_v10, %s1328_s25  ;;  %v276_v63 = vmul.f32 %v263_v59, %v1460_v30  ;;  %s1805_s25 = scalar_lea.vmem %s1858_s4, %s1287_s22 }
  0xf7   : > { %741 = vperm.xlu1 %1312, %v217_v0   ;;  %736 = vperm.xlu0 %1311, %v216_v1   ;;  %v277_v0 = vmul.f32 %v267_v52, %v1460_v30 }
  0xfb   : > { %746 = vperm.xlu0 %1311, %v218_v2  }
 0x105   : > { %v1547_v3 = vpop.permute.xlu1 %348  ;;  %v347_v4 = vpop.permute.xlu0 %346 }
 0x109   : > { %v1549_v5 = vpop.permute.xlu1 %352  ;;  %v1551_v6 = vpop.permute.xlu0 %350 }
 0x10d   : > { %v1553_v7 = vpop.permute.xlu1 %356  ;;  %v1555_v8 = vpop.permute.xlu0 %354 }
 0x111   : > { %v1557_v9 = vpop.permute.xlu1 %360  ;;  %v1559_v11 = vpop.permute.xlu0 %358 }
 0x115   : > { %v365_v12 = vpop.permute.xlu1 %364  ;;  %v363_v14 = vpop.permute.xlu0 %362 }
 0x116   : > { %v376_v53 = vsel %vm370_vm4, %v1557_v9, %v363_v14 }
 0x117   : > { %v392_v60 = vadd.f32 %v376_v53, %v275_v54  ;;  %v271_v53 = vmul.f32 %v267_v52, %v1449_v26 }
 0x119   : > { %v369_v15 = vpop.permute.xlu1 %368  ;;  %v367_v16 = vpop.permute.xlu0 %366 }
 0x11a   : > { %v377_v61 = vsel %vm370_vm4, %v365_v12, %v367_v16  ;;  %v378_v62 = vsel %vm370_vm4, %v367_v16, %v369_v15 }
 0x11b   : > { %v394_v12 = vadd.f32 %v378_v62, %v277_v0  ;;  %v272_v62 = vmul.f32 %v263_v59, %v1462_v31 }
 0x11d   : > { %v464_v17 = vpop.permute.xlu1 %463  ;;  %v1561_v18 = vpop.permute.xlu0 %465 }
 0x11e   : > { %v488_v15 = vsel %vm487_vm2, %v464_v17, %v1561_v18 }
 0x121   : > { %v1563_v19 = vpop.permute.xlu1 %467  ;;  %v1565_v20 = vpop.permute.xlu0 %469 }
 0x122   : > { %v489_v17 = vsel %vm487_vm2, %v1561_v18, %v1563_v19 }
 0x125   : > { %v1567_v21 = vpop.permute.xlu1 %471  ;;  %v1569_v22 = vpop.permute.xlu0 %473 }
 0x126   : > { %v490_v19 = vsel %vm487_vm2, %v1565_v20, %v1567_v21 }
 0x129   : > { %v1571_v23 = vpop.permute.xlu1 %475  ;;  %v1573_v24 = vpop.permute.xlu0 %477 }
 0x12d   : > { %v480_v35 = vpop.permute.xlu1 %479  ;;  %v482_v36 = vpop.permute.xlu0 %481 }
 0x12e   : > { %v493_v57 = vsel %vm487_vm2, %v1573_v24, %v480_v35  ;;  %v371_v35 = vsel %vm370_vm4, %v347_v4, %v1547_v3  ;;  %v372_v4 = vsel %vm370_vm4, %v1547_v3, %v1551_v6  ;;  %v373_v3 = vsel %vm370_vm4, %v1549_v5, %v1555_v8 }
 0x12f   : > { %v509_v1 = vadd.f32 %v493_v57, %v392_v60  ;;  %v374_v6 = vsel %vm370_vm4, %v1555_v8, %v1553_v7  ;;  %v491_v5 = vsel %vm487_vm2, %v1567_v21, %v1569_v22  ;;  %v492_v21 = vsel %vm487_vm2, %v1571_v23, %v1573_v24 }
 0x131   : > { %v484_v37 = vpop.permute.xlu1 %483  ;;  %v486_v39 = vpop.permute.xlu0 %485 }
 0x132   : > { %v495_v40 = vsel %vm487_vm2, %v484_v37, %v486_v39  ;;  %v494_v39 = vsel %vm487_vm2, %v482_v36, %v484_v37 }
 0x133   : > { %v511_v47 = vadd.f32 %v495_v40, %v394_v12  ;;  %v388_v40 = vadd.f32 %v372_v4, %v271_v53 }
 0x135   : > { %v583_v41 = vpop.permute.xlu1 %582  ;;  %v581_v42 = vpop.permute.xlu0 %580  ;;  %v505_v0 = vadd.f32 %v489_v17, %v388_v40 }
 0x136   : > { %v605_v43 = vsel %vm604_vm3, %v581_v42, %v583_v41  ;;  %v270_v42 = vmul.f32 %v263_v59, %v1449_v26 }
 0x138   : > { %v387_v16 = vadd.f32 %v371_v35, %v270_v42 }
 0x139   : > { %v587_v44 = vpop.permute.xlu1 %586  ;;  %v585_v45 = vpop.permute.xlu0 %584 }
 0x13a   : > { %v606_v46 = vsel %vm604_vm3, %v583_v41, %v585_v45  ;;  %v504_v54 = vadd.f32 %v488_v15, %v387_v16 }
 0x13b   : > { %v622_v7 = vadd.f32 %v606_v46, %v505_v0 }
 0x13c   : > { %v621_v57 = vadd.f32 %v605_v43, %v504_v54  ;;  %v389_v43 = vadd.f32 %v373_v3, %v272_v62 }
 0x13d   : > { %v591_v48 = vpop.permute.xlu1 %590  ;;  %v589_v49 = vpop.permute.xlu0 %588 }
 0x13e   : > { %v1581_v50 = vsel %vm604_vm3, %v587_v44, %v589_v49  ;;  %v1584_v51 = vsel %vm604_vm3, %v589_v49, %v591_v48  ;;  %v393_v44 = vadd.f32 %v377_v61, %v276_v63  ;;  %v273_v63 = vmul.f32 %v267_v52, %v1462_v31 }
 0x13f   : > { %v375_v31 = vsel %vm370_vm4, %v1559_v11, %v1557_v9  ;;  %v506_v35 = vadd.f32 %v490_v19, %v389_v43 }
 0x140   : > { %v510_v30 = vadd.f32 %v494_v39, %v393_v44 }
 0x141   : > { %v595_v55 = vpop.permute.xlu1 %594  ;;  %v593_v56 = vpop.permute.xlu0 %592  ;;  %v623_v46 = vadd.f32 %v1581_v50, %v506_v35  ;;  %v221_v35 = vld [vmem:[%s1855_s1 + $0xd0] sm:$0xff] }
 0x142   : > { %v1593_v58 = vsel %vm604_vm3, %v593_v56, %v595_v55 }
 0x145   : > { %v599_v2 = vpop.permute.xlu1 %598  ;;  %v597_v14 = vpop.permute.xlu0 %596 }
 0x146   : > { %v610_v41 = vsel %vm604_vm3, %v595_v55, %v597_v14  ;;  %v274_v14 = vmul.f32 %v263_v59, %v1447_v25 }
 0x147   : > { %v626_v45 = vadd.f32 %v610_v41, %v509_v1  ;;  %v390_v1 = vadd.f32 %v374_v6, %v273_v63 }
 0x148   : > { %v391_v22 = vadd.f32 %v375_v31, %v274_v14  ;;  %v220_v14 = vld [vmem:[%s1855_s1 + $0xc8] sm:$0xff] }
 0x149   : > { %v603_v48 = vpop.permute.xlu1 %602  ;;  %v601_v49 = vpop.permute.xlu0 %600  ;;  %v507_v39 = vadd.f32 %v491_v5, %v390_v1 }
 0x14a   : > { %v611_v36 = vsel %vm604_vm3, %v599_v2, %v601_v49  ;;  %v612_v37 = vsel %vm604_vm3, %v601_v49, %v603_v48  ;;  %v508_v25 = vadd.f32 %v492_v21, %v391_v22  ;;  %v223_v21 = vld [vmem:[%s1855_s1 + $0xe0] sm:$0xff]  ;;  %v225_v22 = vld [vmem:[%s1855_s1 + $0xf0] sm:$0xff] }
 0x14b   : > { %v627_v55 = vadd.f32 %v611_v36, %v510_v30  ;;  %v628_v56 = vadd.f32 %v612_v37, %v511_v47  ;;  %v624_v41 = vadd.f32 %v1584_v51, %v507_v39  ;;  %v222_v39 = vld [vmem:[%s1855_s1 + $0xd8] sm:$0x3f] }
 0x14c   : > { %v625_v15 = vadd.f32 %v1593_v58, %v508_v25 }
 0x14d   : > { %v676_v60 = vpop.permute.xlu1 %675  ;;  %v674_v26 = vpop.permute.xlu0 %673 }
 0x14e   : > { %v698_v61 = vsel %vm697_vm5, %v674_v26, %v676_v60 }
 0x14f   : > { %v1625_v18 = vadd.f32 %v698_v61, %v621_v57 }
 0x151   : > { %v680_v8 = vpop.permute.xlu1 %679  ;;  %v678_v2 = vpop.permute.xlu0 %677 }
 0x152   : > { %v699_v52 = vsel %vm697_vm5, %v676_v60, %v678_v2 }
 0x153   : > { %v1638_v20 = vadd.f32 %v699_v52, %v622_v7  ;;  %v219_v52 = vld [vmem:[%s1855_s1 + $0xc0] sm:$0xff] }
 0x155   : > { %v684_v42 = vpop.permute.xlu1 %683  ;;  %v682_v44 = vpop.permute.xlu0 %681 }
 0x156   : > { %v700_v9 = vsel %vm697_vm5, %v680_v8, %v682_v44  ;;  %v701_v11 = vsel %vm697_vm5, %v682_v44, %v684_v42  ;;  %v228_v42 = vld [vmem:[%s1855_s1 + $0x108] sm:$0xff]  ;;  %v229_v44 = vld [vmem:[%s1855_s1 + $0x110] sm:$0xff] }
 0x157   : > { %v1647_v59 = vadd.f32 %v700_v9, %v623_v46  ;;  %v1649_v12 = vadd.f32 %v701_v11, %v624_v41  ;;  %v226_v46 = vld [vmem:[%s1855_s1 + $0xf8] sm:$0x3f]  ;;  %v227_v41 = vld [vmem:[%s1855_s1 + $0x100] sm:$0xff] }
 0x158   : > { %v230_v9 = vld [vmem:[%s1855_s1 + $0x118] sm:$0x3f] }
 0x159   : > { %v688_v16 = vpop.permute.xlu1 %687  ;;  %v686_v23 = vpop.permute.xlu0 %685 }
 0x15a   : > { %v702_v24 = vsel %vm697_vm5, %v686_v23, %v688_v16 }
 0x15b   : > { %v1653_v50 = vadd.f32 %v702_v24, %v625_v15 }
 0x15d   : > { %v692_v51 = vpop.permute.xlu1 %691  ;;  %v690_v30 = vpop.permute.xlu0 %689 }
 0x15e   : > { %v703_v47 = vsel %vm697_vm5, %v688_v16, %v690_v30 }
 0x15f   : > { %v1656_v48 = vadd.f32 %v703_v47, %v626_v45 }
 0x161   : > { %v696_v49 = vpop.permute.xlu1 %695  ;;  %v694_v53 = vpop.permute.xlu0 %693 }
 0x162   : > { %v704_v4 = vsel %vm697_vm5, %v692_v51, %v694_v53  ;;  %v705_v36 = vsel %vm697_vm5, %v694_v53, %v696_v49 }
 0x163   : > { %v1660_v37 = vadd.f32 %v704_v4, %v627_v55  ;;  %v1662_v58 = vadd.f32 %v705_v36, %v628_v56 }
 0x165   : > { %v723_v54 = vpop.permute.xlu0 %722 }
 0x166   : > { %v724_v17 = vrot.slane %v723_v54, 7 }
 0x168   : > { %v726_v40 = vsel %vm725_vm6, %v724_v17, %v723_v54 }
 0x169   : > { %v728_v57 = vmul.f32 %v726_v40, %v1458_v29 }
 0x16b   : > { %v753_v60 = vrot.slane %v728_v57, %v1454_v27  ;;  %v757_v45 = vrot.slane %v728_v57, %v1456_v28  ;;  %v761_v61 = vrot.slane %v728_v57, %v1472_v34 }
 0x16e   : > { %v732_v26 = vpop.permute.xlu1 %731 }
 0x16f   : > { %v765_v3 = vmul.f32 %v753_v60, %v732_v26  ;;  %v766_v6 = vmul.f32 %v757_v45, %v732_v26  ;;  %v767_v56 = vmul.f32 %v761_v61, %v732_v26 }
 0x171   : > { %791 = vrot.lane.b32.xlu0 %v766_v6, %s1329_s6  ;;  %789 = vrot.lane.b32.xlu1 %v765_v3, %s1329_s6 }
 0x172   : > { %v737_v55 = vpop.permute.xlu0 %736  ;;  %v742_v19 = vpop.permute.xlu1 %741 }
 0x173   : > { %v768_v62 = vmul.f32 %v753_v60, %v737_v55  ;;  %v769_v63 = vmul.f32 %v757_v45, %v737_v55  ;;  %v770_v0 = vmul.f32 %v761_v61, %v737_v55  ;;  %v771_v5 = vmul.f32 %v753_v60, %v742_v19 }
 0x174   : > { %v772_v43 = vmul.f32 %v757_v45, %v742_v19  ;;  %v773_v7 = vmul.f32 %v761_v61, %v742_v19 }
 0x175   : > { %793 = vrot.lane.b32.xlu1 %v767_v56, %s1329_s6  ;;  %795 = vrot.lane.b32.xlu0 %v768_v62, %s1329_s6 }
 0x176   : > { %v747_v1 = vpop.permute.xlu0 %746 }
 0x177   : > { %v774_v8 = vmul.f32 %v753_v60, %v747_v1  ;;  %v775_v2 = vmul.f32 %v757_v45, %v747_v1  ;;  %v776_v31 = vmul.f32 %v761_v61, %v747_v1 }
 0x179   : > { %797 = vrot.lane.b32.xlu1 %v769_v63, %s1329_s6  ;;  %799 = vrot.lane.b32.xlu0 %v770_v0, %s1329_s6 }
 0x17d   : > { %801 = vrot.lane.b32.xlu1 %v771_v5, %s1329_s6  ;;  %803 = vrot.lane.b32.xlu0 %v772_v43, %s1329_s6 }
 0x181   : > { %805 = vrot.lane.b32.xlu1 %v773_v7, %s1329_s6  ;;  %807 = vrot.lane.b32.xlu0 %v774_v8, %s1329_s6 }
 0x185   : > { %809 = vrot.lane.b32.xlu1 %v775_v2, %s1329_s6  ;;  %811 = vrot.lane.b32.xlu0 %v776_v31, %s1329_s6 }
 0x189   : > { %838 = vrot.lane.b32.xlu1 %v1410_v13, %s1330_s9  ;;  %847 = vperm.xlu0 %1311, %v219_v52   ;;  %v224_v13 = vld [vmem:[%s1855_s1 + $0xe8] sm:$0xff]  ;;  %s1332_s9 = smov 96  }
 0x18d   : > { %852 = vperm.xlu1 %1312, %v220_v14   ;;  %857 = vperm.xlu0 %1311, %v221_v35  }
 0x191   : > { %862 = vperm.xlu1 %1312, %v222_v39   ;;  %956 = vperm.xlu0 %1311, %v223_v21  }
 0x195   : > { %961 = vperm.xlu1 %1312, %v224_v13   ;;  %966 = vperm.xlu0 %1311, %v225_v22  }
 0x199   : > { %971 = vperm.xlu1 %1312, %v226_v46   ;;  %1047 = vrot.lane.b32.xlu0 %v1398_v10, %s1331_s26 }
 0x19d   : > { %1056 = vperm.xlu1 %1312, %v227_v41   ;;  %1061 = vperm.xlu0 %1311, %v228_v42  }
 0x1a1   : > { %1066 = vperm.xlu1 %1312, %v229_v44   ;;  %1071 = vperm.xlu0 %1311, %v230_v9  }
 0x1e3   : > { %v790_v10 = vpop.permute.xlu1 %789  ;;  %v792_v11 = vpop.permute.xlu0 %791 }
 0x1e4   : > { %v814_v25 = vsel %vm813_vm7, %v790_v10, %v792_v11 }
 0x1e5   : > { %v1708_v15 = vadd.f32 %v814_v25, %v1625_v18 }
 0x1e7   : > { %v794_v16 = vpop.permute.xlu1 %793  ;;  %v796_v23 = vpop.permute.xlu0 %795 }
 0x1e8   : > { %v815_v24 = vsel %vm813_vm7, %v792_v11, %v794_v16 }
 0x1e9   : > { %v1712_v51 = vadd.f32 %v815_v24, %v1638_v20 }
 0x1eb   : > { %v798_v30 = vpop.permute.xlu1 %797  ;;  %v800_v47 = vpop.permute.xlu0 %799 }
 0x1ec   : > { %v816_v49 = vsel %vm813_vm7, %v796_v23, %v798_v30  ;;  %v817_v53 = vsel %vm813_vm7, %v798_v30, %v800_v47 }
 0x1ed   : > { %v1717_v4 = vadd.f32 %v816_v49, %v1647_v59  ;;  %v1720_v36 = vadd.f32 %v817_v53, %v1649_v12 }
 0x1ef   : > { %v802_v18 = vpop.permute.xlu1 %801  ;;  %v804_v54 = vpop.permute.xlu0 %803 }
 0x1f0   : > { %v818_v17 = vsel %vm813_vm7, %v802_v18, %v804_v54 }
 0x1f1   : > { %v1724_v40 = vadd.f32 %v818_v17, %v1653_v50 }
 0x1f3   : > { %v806_v20 = vpop.permute.xlu1 %805  ;;  %v808_v57 = vpop.permute.xlu0 %807 }
 0x1f4   : > { %v819_v60 = vsel %vm813_vm7, %v804_v54, %v806_v20  ;;  %v232_v20 = vld [vmem:[%s1856_s2 + $0x8] sm:$0xff] }
 0x1f5   : > { %v1728_v45 = vadd.f32 %v819_v60, %v1656_v48 }
 0x1f7   : > { %v810_v26 = vpop.permute.xlu1 %809  ;;  %v812_v59 = vpop.permute.xlu0 %811 }
 0x1f8   : > { %v820_v3 = vsel %vm813_vm7, %v808_v57, %v810_v26  ;;  %v821_v12 = vsel %vm813_vm7, %v810_v26, %v812_v59  ;;  %v231_v57 = vld [vmem:[%s1856_s2] sm:$0xff] }
 0x1f9   : > { %v1733_v6 = vadd.f32 %v820_v3, %v1660_v37  ;;  %v1736_v61 = vadd.f32 %v821_v12, %v1662_v58 }
 0x1fb   : > { %v839_v50 = vpop.permute.xlu1 %838 }
 0x1fc   : > { %v840_v55 = vrot.slane %v839_v50, 7 }
 0x1fe   : > { %v842_v56 = vsel %vm841_vm8, %v840_v55, %v839_v50 }
 0x1ff   : > { %v844_v62 = vmul.f32 %v842_v56, %v1458_v29 }
 0x201   : > { %v869_v48 = vrot.slane %v844_v62, %v1454_v27  ;;  %v873_v63 = vrot.slane %v844_v62, %v1456_v28  ;;  %v877_v43 = vrot.slane %v844_v62, %v1472_v34 }
 0x204   : > { %v848_v0 = vpop.permute.xlu0 %847 }
 0x205   : > { %v881_v19 = vmul.f32 %v869_v48, %v848_v0  ;;  %v882_v5 = vmul.f32 %v873_v63, %v848_v0  ;;  %v883_v58 = vmul.f32 %v877_v43, %v848_v0 }
 0x207   : > { %907 = vrot.lane.b32.xlu0 %v882_v5, %s1332_s9  ;;  %905 = vrot.lane.b32.xlu1 %v881_v19, %s1332_s9 }
 0x208   : > { %v853_v37 = vpop.permute.xlu1 %852  ;;  %v858_v2 = vpop.permute.xlu0 %857 }
 0x209   : > { %v884_v1 = vmul.f32 %v869_v48, %v853_v37  ;;  %v885_v7 = vmul.f32 %v873_v63, %v853_v37  ;;  %v886_v8 = vmul.f32 %v877_v43, %v853_v37  ;;  %v887_v31 = vmul.f32 %v869_v48, %v858_v2 }
 0x20a   : > { %v888_v52 = vmul.f32 %v873_v63, %v858_v2  ;;  %v889_v35 = vmul.f32 %v877_v43, %v858_v2 }
 0x20b   : > { %911 = vrot.lane.b32.xlu0 %v884_v1, %s1332_s9  ;;  %909 = vrot.lane.b32.xlu1 %v883_v58, %s1332_s9 }
 0x20c   : > { %v863_v14 = vpop.permute.xlu1 %862  ;;  %v957_v22 = vpop.permute.xlu0 %956 }
 0x20d   : > { %v890_v39 = vmul.f32 %v869_v48, %v863_v14  ;;  %v891_v21 = vmul.f32 %v873_v63, %v863_v14  ;;  %v892_v13 = vmul.f32 %v877_v43, %v863_v14  ;;  %v974_v46 = vmul.f32 %v957_v22, %v1470_v33 }
 0x20e   : > { %v975_v41 = vmul.f32 %v957_v22, %v1466_v32  ;;  %v976_v44 = vmul.f32 %v957_v22, %v1478_v38 }
 0x20f   : > { %915 = vrot.lane.b32.xlu0 %v886_v8, %s1332_s9  ;;  %913 = vrot.lane.b32.xlu1 %v885_v7, %s1332_s9 }
 0x210   : > { %v962_v42 = vpop.permute.xlu1 %961  ;;  %v967_v25 = vpop.permute.xlu0 %966 }
 0x211   : > { %v977_v9 = vmul.f32 %v962_v42, %v1470_v33  ;;  %v978_v10 = vmul.f32 %v962_v42, %v1466_v32  ;;  %v979_v11 = vmul.f32 %v962_v42, %v1478_v38  ;;  %v980_v16 = vmul.f32 %v967_v25, %v1470_v33 }
 0x212   : > { %v981_v23 = vmul.f32 %v967_v25, %v1466_v32  ;;  %v982_v47 = vmul.f32 %v967_v25, %v1478_v38 }
 0x213   : > { %919 = vrot.lane.b32.xlu0 %v888_v52, %s1332_s9  ;;  %917 = vrot.lane.b32.xlu1 %v887_v31, %s1332_s9 }
 0x214   : > { %v972_v24 = vpop.permute.xlu1 %971  ;;  %v1048_v30 = vpop.permute.xlu0 %1047 }
 0x215   : > { %v983_v49 = vmul.f32 %v972_v24, %v1470_v33  ;;  %v1049_v53 = vrot.slane %v1048_v30, 7  ;;  %v984_v18 = vmul.f32 %v972_v24, %v1466_v32  ;;  %v985_v54 = vmul.f32 %v972_v24, %v1478_v38  ;;  %v234_v32 = vld [vmem:[%s1856_s2 + $0x18] sm:$0x3f]  ;;  %v233_v38 = vld [vmem:[%s1856_s2 + $0x10] sm:$0xff] }
 0x217   : > { %923 = vrot.lane.b32.xlu0 %v890_v39, %s1332_s9  ;;  %921 = vrot.lane.b32.xlu1 %v889_v35, %s1332_s9  ;;  %v1051_v17 = vsel %vm1050_vm9, %v1049_v53, %v1048_v30 }
 0x218   : > { %v1053_v33 = vmul.f32 %v1051_v17, %v1458_v29  ;;  %v1057_v59 = vpop.permute.xlu1 %1056  ;;  %v1062_v50 = vpop.permute.xlu0 %1061 }
 0x21a   : > { %v1078_v60 = vrot.slane %v1053_v33, %v1454_v27  ;;  %v1082_v26 = vrot.slane %v1053_v33, %v1456_v28  ;;  %v1086_v3 = vrot.slane %v1053_v33, %v1472_v34 }
 0x21b   : > { %927 = vrot.lane.b32.xlu0 %v892_v13, %s1332_s9  ;;  %925 = vrot.lane.b32.xlu1 %v891_v21, %s1332_s9 }
 0x21c   : > { %v1090_v29 = vmul.f32 %v1078_v60, %v1057_v59  ;;  %v1091_v12 = vmul.f32 %v1082_v26, %v1057_v59  ;;  %v1092_v55 = vmul.f32 %v1086_v3, %v1057_v59  ;;  %v1093_v56 = vmul.f32 %v1078_v60, %v1062_v50  ;;  %v1067_v27 = vpop.permute.xlu1 %1066  ;;  %v1072_v0 = vpop.permute.xlu0 %1071 }
 0x21d   : > { %v1094_v62 = vmul.f32 %v1082_v26, %v1062_v50  ;;  %v1095_v48 = vmul.f32 %v1086_v3, %v1062_v50  ;;  %v1096_v28 = vmul.f32 %v1078_v60, %v1067_v27  ;;  %v1097_v63 = vmul.f32 %v1082_v26, %v1067_v27 }
 0x21e   : > { %v1098_v34 = vmul.f32 %v1086_v3, %v1067_v27  ;;  %v1099_v19 = vmul.f32 %v1078_v60, %v1072_v0  ;;  %v1100_v5 = vmul.f32 %v1082_v26, %v1072_v0  ;;  %v1101_v43 = vmul.f32 %v1086_v3, %v1072_v0 }
 0x21f   : > { %1000 = vrot.lane.b32.xlu0 %v975_v41, %s1333_s10  ;;  %998 = vrot.lane.b32.xlu1 %v974_v46, %s1333_s10 }
 0x223   : > { %1004 = vrot.lane.b32.xlu0 %v977_v9, %s1333_s10  ;;  %1002 = vrot.lane.b32.xlu1 %v976_v44, %s1333_s10 }
 0x227   : > { %1008 = vrot.lane.b32.xlu0 %v979_v11, %s1333_s10  ;;  %1006 = vrot.lane.b32.xlu1 %v978_v10, %s1333_s10 }
 0x22b   : > { %1012 = vrot.lane.b32.xlu0 %v981_v23, %s1333_s10  ;;  %1010 = vrot.lane.b32.xlu1 %v980_v16, %s1333_s10 }
 0x22f   : > { %1016 = vrot.lane.b32.xlu0 %v983_v49, %s1333_s10  ;;  %1014 = vrot.lane.b32.xlu1 %v982_v47, %s1333_s10 }
 0x233   : > { %1020 = vrot.lane.b32.xlu0 %v985_v54, %s1333_s10  ;;  %1018 = vrot.lane.b32.xlu1 %v984_v18, %s1333_s10 }
 0x237   : > { %1170 = vperm.xlu0 %1311, %v232_v20   ;;  %1165 = vperm.xlu1 %1312, %v231_v57  }
 0x23b   : > { %1180 = vperm.xlu0 %1311, %v234_v32   ;;  %1175 = vperm.xlu1 %1312, %v233_v38  }
 0x23f   : > { %1116 = vrot.lane.b32.xlu0 %v1091_v12, %s1334_s21  ;;  %1114 = vrot.lane.b32.xlu1 %v1090_v29, %s1334_s21 }
 0x243   : > { %1118 = vrot.lane.b32.xlu1 %v1092_v55, %s1334_s21  ;;  %1120 = vrot.lane.b32.xlu0 %v1093_v56, %s1334_s21 }
 0x247   : > { %1122 = vrot.lane.b32.xlu1 %v1094_v62, %s1334_s21  ;;  %1124 = vrot.lane.b32.xlu0 %v1095_v48, %s1334_s21 }
 0x24b   : > { %1126 = vrot.lane.b32.xlu1 %v1096_v28, %s1334_s21  ;;  %1128 = vrot.lane.b32.xlu0 %v1097_v63, %s1334_s21 }
 0x24f   : > { %1130 = vrot.lane.b32.xlu1 %v1098_v34, %s1334_s21  ;;  %1132 = vrot.lane.b32.xlu0 %v1099_v19, %s1334_s21 }
 0x253   : > { %1134 = vrot.lane.b32.xlu1 %v1100_v5, %s1334_s21  ;;  %1136 = vrot.lane.b32.xlu0 %v1101_v43, %s1334_s21 }
 0x279   : > { %v906_v37 = vpop.permute.xlu1 %905  ;;  %v908_v58 = vpop.permute.xlu0 %907 }
 0x27a   : > { %v930_v47 = vsel %vm929_vm10, %v906_v37, %v908_v58 }
 0x27b   : > { %v946_v54 = vadd.f32 %v930_v47, %v1708_v15 }
 0x27d   : > { %v910_v1 = vpop.permute.xlu1 %909  ;;  %v912_v7 = vpop.permute.xlu0 %911 }
 0x27e   : > { %v931_v17 = vsel %vm929_vm10, %v908_v58, %v910_v1 }
 0x27f   : > { %v947_v60 = vadd.f32 %v931_v17, %v1712_v51 }
 0x281   : > { %v914_v8 = vpop.permute.xlu1 %913  ;;  %v916_v2 = vpop.permute.xlu0 %915 }
 0x282   : > { %v932_v59 = vsel %vm929_vm10, %v912_v7, %v914_v8  ;;  %v933_v3 = vsel %vm929_vm10, %v914_v8, %v916_v2 }
 0x283   : > { %v948_v62 = vadd.f32 %v932_v59, %v1717_v4  ;;  %v949_v48 = vadd.f32 %v933_v3, %v1720_v36 }
 0x285   : > { %v918_v31 = vpop.permute.xlu1 %917  ;;  %v1770_v52 = vpop.permute.xlu0 %919 }
 0x286   : > { %v934_v63 = vsel %vm929_vm10, %v918_v31, %v1770_v52 }
 0x287   : > { %v950_v36 = vadd.f32 %v934_v63, %v1724_v40 }
 0x289   : > { %v1772_v14 = vpop.permute.xlu1 %921  ;;  %v1774_v35 = vpop.permute.xlu0 %923 }
 0x28a   : > { %v935_v2 = vsel %vm929_vm10, %v1770_v52, %v1772_v14 }
 0x28b   : > { %v951_v40 = vadd.f32 %v935_v2, %v1728_v45 }
 0x28d   : > { %v1776_v39 = vpop.permute.xlu1 %925  ;;  %v1778_v21 = vpop.permute.xlu0 %927 }
 0x28e   : > { %v936_v52 = vsel %vm929_vm10, %v1774_v35, %v1776_v39  ;;  %v937_v14 = vsel %vm929_vm10, %v1776_v39, %v1778_v21 }
 0x28f   : > { %v952_v39 = vadd.f32 %v936_v52, %v1733_v6  ;;  %v953_v21 = vadd.f32 %v937_v14, %v1736_v61 }
 0x291   : > { %v999_v13 = vpop.permute.xlu1 %998  ;;  %v1001_v22 = vpop.permute.xlu0 %1000 }
 0x292   : > { %v1023_v18 = vsel %vm1022_vm11, %v999_v13, %v1001_v22 }
 0x293   : > { %v1039_v20 = vadd.f32 %v1023_v18, %v946_v54 }
 0x295   : > { %v1003_v46 = vpop.permute.xlu1 %1002  ;;  %v1005_v41 = vpop.permute.xlu0 %1004 }
 0x296   : > { %v1024_v32 = vsel %vm1022_vm11, %v1001_v22, %v1003_v46 }
 0x297   : > { %v1040_v29 = vadd.f32 %v1024_v32, %v947_v60 }
 0x299   : > { %v1007_v42 = vpop.permute.xlu1 %1006  ;;  %v1009_v44 = vpop.permute.xlu0 %1008 }
 0x29a   : > { %v1025_v55 = vsel %vm1022_vm11, %v1005_v41, %v1007_v42  ;;  %v1026_v56 = vsel %vm1022_vm11, %v1007_v42, %v1009_v44 }
 0x29b   : > { %v1041_v0 = vadd.f32 %v1025_v55, %v948_v62  ;;  %v1042_v34 = vadd.f32 %v1026_v56, %v949_v48 }
 0x29d   : > { %v1011_v9 = vpop.permute.xlu1 %1010  ;;  %v1013_v10 = vpop.permute.xlu0 %1012 }
 0x29e   : > { %v1027_v37 = vsel %vm1022_vm11, %v1011_v9, %v1013_v10 }
 0x29f   : > { %v1043_v31 = vadd.f32 %v1027_v37, %v950_v36 }
 0x2a1   : > { %v1015_v11 = vpop.permute.xlu1 %1014  ;;  %v1780_v25 = vpop.permute.xlu0 %1016 }
 0x2a2   : > { %v1028_v42 = vsel %vm1022_vm11, %v1013_v10, %v1015_v11 }
 0x2a5   : > { %v1782_v16 = vpop.permute.xlu1 %1018  ;;  %v1784_v23 = vpop.permute.xlu0 %1020 }
 0x2a6   : > { %v1029_v45 = vsel %vm1022_vm11, %v1780_v25, %v1782_v16  ;;  %v1030_v35 = vsel %vm1022_vm11, %v1782_v16, %v1784_v23 }
 0x2b2   : > { %v1166_v24 = vpop.permute.xlu1 %1165  ;;  %v1171_v30 = vpop.permute.xlu0 %1170 }
 0x2b6   : > { %v1787_v49 = vpop.permute.xlu1 %1175  ;;  %v1789_v53 = vpop.permute.xlu0 %1180 }
 0x2ba   : > { %v1115_v57 = vpop.permute.xlu1 %1114  ;;  %v1117_v33 = vpop.permute.xlu0 %1116 }
 0x2bb   : > { %v1139_v38 = vsel %vm1138_vm12, %v1115_v57, %v1117_v33  ;;  %v1045_v57 = vadd.f32 %v1029_v45, %v952_v39 }
 0x2bc   : > { %v1155_v26 = vadd.f32 %v1139_v38, %v1039_v20 }
 0x2be   : > { %v1183_v15 = vadd.f32 %v1166_v24, %v1155_v26  ;;  %v1119_v12 = vpop.permute.xlu1 %1118  ;;  %v1121_v50 = vpop.permute.xlu0 %1120 }
 0x2bf   : > { %v1140_v51 = vsel %vm1138_vm12, %v1117_v33, %v1119_v12  ;;  %v1046_v33 = vadd.f32 %v1030_v35, %v953_v21 }
 0x2c0   : > { %v1277_v27 = vclamps-f32 %v1183_v15, 10.0  ;;  %v1156_v28 = vadd.f32 %v1140_v51, %v1040_v29 }
 0x2c2   : > { %1207 = vst [vmem:[%s1805_s25] sm:$0xff] %v1277_v27  ;;  %v1184_v19 = vadd.f32 %v1166_v24, %v1156_v28  ;;  %v1123_v5 = vpop.permute.xlu1 %1122  ;;  %v1125_v43 = vpop.permute.xlu0 %1124 }
 0x2c3   : > { %v1141_v58 = vsel %vm1138_vm12, %v1121_v50, %v1123_v5  ;;  %v1142_v4 = vsel %vm1138_vm12, %v1123_v5, %v1125_v43 }
 0x2c4   : > { %v1278_v1 = vclamps-f32 %v1184_v19, 10.0  ;;  %v1157_v7 = vadd.f32 %v1141_v58, %v1041_v0  ;;  %v1158_v8 = vadd.f32 %v1142_v4, %v1042_v34 }
 0x2c6   : > { %1208 = vst [vmem:[%s1805_s25 + $0x8] sm:$0xff] %v1278_v1  ;;  %v1185_v13 = vadd.f32 %v1171_v30, %v1157_v7  ;;  %v1186_v22 = vadd.f32 %v1171_v30, %v1158_v8  ;;  %v1127_v46 = vpop.permute.xlu1 %1126  ;;  %v1129_v41 = vpop.permute.xlu0 %1128  ;;  %v1044_v30 = vadd.f32 %v1028_v42, %v951_v40 }
 0x2c7   : > { %v1143_v44 = vsel %vm1138_vm12, %v1127_v46, %v1129_v41 }
 0x2c8   : > { %v1279_v9 = vclamps-f32 %v1185_v13, 10.0  ;;  %v1280_v24 = vclamps-f32 %v1186_v22, 10.0  ;;  %v1159_v47 = vadd.f32 %v1143_v44, %v1043_v31 }
 0x2ca   : > { %1209 = vst [vmem:[%s1805_s25 + $0x10] sm:$0xff] %v1279_v9  ;;  %1210 = vst [vmem:[%s1805_s25 + $0x18] sm:$0xff] %v1280_v24  ;;  %v1187_v10 = vadd.f32 %v1787_v49, %v1159_v47  ;;  %v1131_v11 = vpop.permute.xlu1 %1130  ;;  %v1133_v18 = vpop.permute.xlu0 %1132 }
 0x2cb   : > { %v1144_v54 = vsel %vm1138_vm12, %v1129_v41, %v1131_v11 }
 0x2cc   : > { %v1281_v17 = vclamps-f32 %v1187_v10, 10.0  ;;  %v1160_v20 = vadd.f32 %v1144_v54, %v1044_v30 }
 0x2ce   : > { %1211 = vst [vmem:[%s1805_s25 + $0x20] sm:$0xff] %v1281_v17  ;;  %v1188_v25 = vadd.f32 %v1787_v49, %v1160_v20  ;;  %v1135_v32 = vpop.permute.xlu1 %1134  ;;  %v1137_v38 = vpop.permute.xlu0 %1136 }
 0x2cf   : > { %v1145_v16 = vsel %vm1138_vm12, %v1133_v18, %v1135_v32  ;;  %v1146_v23 = vsel %vm1138_vm12, %v1135_v32, %v1137_v38 }
 0x2d0   : > { %v1282_v60 = vclamps-f32 %v1188_v25, 10.0  ;;  %v1161_v26 = vadd.f32 %v1145_v16, %v1045_v57  ;;  %v1162_v6 = vadd.f32 %v1146_v23, %v1046_v33 }
 0x2d2   : > { %1212 = vst [vmem:[%s1805_s25 + $0x28] sm:$0xff] %v1282_v60  ;;  %v1189_v61 = vadd.f32 %v1789_v53, %v1161_v26  ;;  %v1190_v59 = vadd.f32 %v1789_v53, %v1162_v6 }
 0x2d4   : > { %v1283_v3 = vclamps-f32 %v1189_v61, 10.0  ;;  %v1284_v29 = vclamps-f32 %v1190_v59, 10.0 }
 0x2d6   : > { %1213 = vst [vmem:[%s1805_s25 + $0x30] sm:$0x3f] %v1283_v3  ;;  %1214 = vst [vmem:[%s1805_s25 + $0x38] sm:$0x3f] %v1284_v29 }
 0x2d7 PF: > { %s14_s15 = sadd.s32 1, %s1319_s15  }
 0x2d8   : > { %p11_p4 = scmp.ge.s32.totalorder %s14_s15, 4  }
 0x2da   :  { %13 = sbr.rel (!%p11_p4) target bundleno = 1 (0x1), region = 66 }

</bundles_post_ra>
